<compile_context>
chip_gen: v5e
topology: v5e:2x2
jax: 0.10.0
libtpu: 0.0.40
codegen_flags: <defaults>
</compile_context>

<pallas_src>
import math

import jax
import jax.numpy as jnp
from jax.experimental import pallas as pl
from jax.experimental.pallas import tpu as pltpu


def _sinusoidal_kernel(time_ref, consts_ref, out_ref):
    # time_ref:   (TR, 1) or (TR, L) f32 timesteps (lane-expanded when packed)
    # consts_ref: (2, L)  f32: row 0 = frequency table, row 1 = phase (0 / pi/2)
    # out_ref:    (TR, L)
    freqs = consts_ref[0:1, :]                         # (1, L)
    phase = consts_ref[1:2, :]                         # (1, L)
    args = time_ref[...] * freqs + phase               # broadcasts to (TR, L), f32
    out_ref[...] = jnp.sin(args).astype(out_ref.dtype)


def _choose_row_tile(num_rows: int, lane_w: int, block_rows=None) -> int:
    """Rows per grid step: full extent for small problems; capped + >=2 steps for big."""
    if block_rows is not None:                         # explicit override (tests)
        tr = min(num_rows, int(block_rows))
        if tr < num_rows:
            tr = max(8, (tr // 8) * 8)
        return tr
    MAX_TILE_ELEMS = (2 * 1024 * 1024) // 4   # 2 MiB f32/buffer -> ~8 MiB double-buffered
    MIN_TILE_ELEMS = 128 * 1024               # ~break-even vs ~0.35us per-step overhead
    total = num_rows * lane_w
    if total <= MAX_TILE_ELEMS and total < 2 * MIN_TILE_ELEMS:
        return num_rows                        # single grid step (launch-overhead bound)
    tr = min(num_rows, max(8, (MAX_TILE_ELEMS // lane_w) // 8 * 8))
    if tr >= num_rows:
        # Big enough to care: force >= 2 steps so v7x shards the parallel axis over 2 TCs.
        tr = min(num_rows, max(8, ((-(-num_rows // 2)) + 7) // 8 * 8))
    return tr


def sinusoidal_position_embeddings(time: jax.Array, dim: int,
                                    *, out_dtype=jnp.float32,
                                    block_rows=None) -> jax.Array:
    """time: (B,) timesteps -> (B, dim) embeddings (sin half, cos half)."""
    assert dim % 2 == 0 and dim >= 2, "dim must be a positive even number"
    half_dim = dim // 2
    b = time.shape[0]

    # Constant tables, built exactly like the reference so in-kernel args match.
    if half_dim > 1:
        scale = math.log(10000.0) / (half_dim - 1)
    else:
        scale = 0.0   # dim == 2: reference divides by zero (NaN); we use freq = 1.0
    freqs = jnp.exp(jnp.arange(half_dim, dtype=jnp.float32) * -scale)     # (half,)
    freqs_full = jnp.concatenate([freqs, freqs])                          # (dim,)
    phase_full = jnp.concatenate(
        [jnp.zeros((half_dim,), jnp.float32),
         jnp.full((half_dim,), math.pi / 2, dtype=jnp.float32)])          # (dim,)

    tf32 = time.astype(jnp.float32)

    # ---- make the kernel's lane axis dense (multiple of 128 lanes) ----
    if dim < 128 and 128 % dim == 0:
        # Pack k batch rows per vreg row: sin polynomial and stores use every lane.
        k = 128 // dim
        lane_w = 128
        rows = -(-b // k)
        t_pad = jnp.pad(tf32, (0, rows * k - b))
        time_in = jnp.repeat(t_pad.reshape(rows, k), dim, axis=1)         # (rows, 128)
        freqs_lane = jnp.tile(freqs_full, k).reshape(1, lane_w)
        phase_lane = jnp.tile(phase_full, k).reshape(1, lane_w)
        packed = True
    else:
        # Pad the lane axis to a multiple of 128 -> unmasked full-width stores.
        k = 1
        rows = b
        lane_w = -(-dim // 128) * 128
        pad = lane_w - dim
        freqs_lane = jnp.pad(freqs_full, (0, pad)).reshape(1, lane_w)
        phase_lane = jnp.pad(phase_full, (0, pad)).reshape(1, lane_w)     # sin(0)=0 pad
        time_in = tf32.reshape(b, 1)
        packed = False

    consts = jnp.concatenate([freqs_lane, phase_lane], axis=0)            # (2, lane_w)

    tr = _choose_row_tile(rows, lane_w, block_rows)
    grid = (pl.cdiv(rows, tr),)
    t_last = time_in.shape[1]

    cost = pl.CostEstimate(
        flops=25 * rows * lane_w,              # sin range-reduction + polynomial dominates
        transcendentals=rows * lane_w,
        bytes_accessed=(time_in.size + consts.size) * 4
                       + rows * lane_w * jnp.dtype(out_dtype).itemsize,
    )

    out = pl.pallas_call(
        _sinusoidal_kernel,
        out_shape=jax.ShapeDtypeStruct((rows, lane_w), out_dtype),
        grid=grid,
        in_specs=[
            pl.BlockSpec((tr, t_last), lambda i: (i, 0)),   # timesteps, tiled over rows
            pl.BlockSpec((2, lane_w), lambda i: (0, 0)),    # constant freq/phase block
        ],
        out_specs=pl.BlockSpec((tr, lane_w), lambda i: (i, 0)),
        compiler_params=pltpu.CompilerParams(
            dimension_semantics=("parallel",),              # v7x: shard rows over 2 TCs
        ),
        cost_estimate=cost,
    )(time_in, consts)

    if packed:
        out = out.reshape(rows * k, dim)[:b]
    elif lane_w != dim:
        out = out[:, :dim]
    return out


def _reference(time: jax.Array, dim: int) -> jax.Array:
    # Direct transcription of the PyTorch forward.
    half_dim = dim // 2
    emb = math.log(10000.0) / (half_dim - 1)
    emb = jnp.exp(jnp.arange(half_dim, dtype=jnp.float32) * -emb)
    emb = time.astype(jnp.float32)[:, None] * emb[None, :]
    return jnp.concatenate([jnp.sin(emb), jnp.cos(emb)], axis=-1)


if __name__ == "__main__":
    key = jax.random.PRNGKey(0)

    # Case 1: typical diffusion timestep shape (dim=32 -> lane-packed, 4 rows per vreg row).
    b1, d1 = 8, 32
    t1 = jax.random.randint(key, (b1,), 0, 1000).astype(jnp.float32)
    o1 = jax.block_until_ready(sinusoidal_position_embeddings(t1, d1))
    r1 = _reference(t1, d1)
    assert o1.shape == (b1, d1)
    # sin/cos of args up to ~1e3 rad carry ~ulp(arg)~1e-4 f32 argument-rounding
    # uncertainty (plus the cos = sin(x+pi/2) trick), so compare at 1e-3 abs.
    e1 = float(jnp.max(jnp.abs(o1 - r1)))
    assert e1 < 1e-3, f"dim=32 mismatch vs reference: max_err={e1}"

    # Case 2: dim=128 (exactly lane-dense); force a 3-step pipelined grid (test-only tile).
    b2, d2 = 48, 128
    t2 = jax.random.randint(jax.random.PRNGKey(1), (b2,), 0, 1000).astype(jnp.float32)
    o2 = jax.block_until_ready(
        sinusoidal_position_embeddings(t2, d2, block_rows=16))    # grid=(3,)
    r2 = _reference(t2, d2)
    e2 = float(jnp.max(jnp.abs(o2 - r2)))
    assert o2.shape == (b2, d2) and e2 < 1e-3, f"dim=128 mismatch: max_err={e2}"

    # Case 3: dim=96 (not a divisor of 128 -> lane-padded to 128, sliced back).
    b3, d3 = 5, 96
    t3 = jax.random.randint(jax.random.PRNGKey(2), (b3,), 0, 1000).astype(jnp.float32)
    o3 = jax.block_until_ready(sinusoidal_position_embeddings(t3, d3))
    r3 = _reference(t3, d3)
    e3 = float(jnp.max(jnp.abs(o3 - r3)))
    assert o3.shape == (b3, d3) and e3 < 1e-3, f"dim=96 mismatch: max_err={e3}"

    print("KERNEL_OK")
</pallas_src>

<mosaic_0001>
module attributes {stable_mosaic.version = 11 : i64} {
  func.func @_sinusoidal_kernel(%arg0: i32, %arg1: memref<2x128xf32, #tpu.memory_space<vmem>>, %arg2: memref<2x128xf32, #tpu.memory_space<vmem>>, %arg3: memref<2x128xf32, #tpu.memory_space<vmem>>) attributes {dimension_semantics = [#tpu.dimension_semantics<parallel>], iteration_bounds = array<i64: 1>, scalar_prefetch = 0 : i64, scratch_operands = 0 : i64, tpu.core_type = #tpu.core_type<tc>, window_params = [{transform_indices = @transform_0, window_bounds = array<i64: 2, 128>}, {pipeline_mode = #tpu.pipeline_mode<synchronous>, transform_indices = @transform_1, window_bounds = array<i64: 2, 128>}, {transform_indices = @transform_2, window_bounds = array<i64: 2, 128>}]} {
    %c0 = arith.constant 0 : index
    %c0_0 = arith.constant 0 : index
    %0 = vector.load %arg2[%c0, %c0_0] : memref<2x128xf32, #tpu.memory_space<vmem>>, vector<1x128xf32>
    %c1 = arith.constant 1 : index
    %c0_1 = arith.constant 0 : index
    %1 = vector.load %arg2[%c1, %c0_1] : memref<2x128xf32, #tpu.memory_space<vmem>>, vector<1x128xf32>
    %c0_2 = arith.constant 0 : index
    %c0_3 = arith.constant 0 : index
    %2 = vector.load %arg1[%c0_2, %c0_3] : memref<2x128xf32, #tpu.memory_space<vmem>>, vector<2x128xf32>
    %3 = vector.broadcast %0 : vector<1x128xf32> to vector<2x128xf32>
    %4 = arith.mulf %2, %3 : vector<2x128xf32>
    %5 = vector.broadcast %1 : vector<1x128xf32> to vector<2x128xf32>
    %6 = arith.addf %4, %5 : vector<2x128xf32>
    %7 = math.sin %6 : vector<2x128xf32>
    %c0_4 = arith.constant 0 : index
    %c0_5 = arith.constant 0 : index
    %8 = vector.load %arg3[%c0_4, %c0_5] : memref<2x128xf32, #tpu.memory_space<vmem>>, vector<2x128xf32>
    tpu.vector_store %arg3[%c0_4, %c0_5], %7 {strides = array<i32>} : memref<2x128xf32, #tpu.memory_space<vmem>>, vector<2x128xf32>,
    return
  }
  func.func @transform_0(%arg0: i32) -> (i32, i32) {
    %c0_i32 = arith.constant 0 : i32
    %c0_i32_0 = arith.constant 0 : i32
    return %arg0, %c0_i32 : i32, i32
  }
  func.func @transform_1(%arg0: i32) -> (i32, i32) {
    %c0_i32 = arith.constant 0 : i32
    %c0_i32_0 = arith.constant 0 : i32
    %c0_i32_1 = arith.constant 0 : i32
    return %c0_i32, %c0_i32_0 : i32, i32
  }
  func.func @transform_2(%arg0: i32) -> (i32, i32) {
    %c0_i32 = arith.constant 0 : i32
    %c0_i32_0 = arith.constant 0 : i32
    return %arg0, %c0_i32 : i32, i32
  }
}

</mosaic_0001>

<bundles_post_ra>
// kernel: tpu_custom_call.1
= control target key start
LH: loop header
LB: loop body
LE: loop exit
PB: predicated region body
PF: predicated region fallthrough
CT: control target
= control target key end

     0   :  { %7 = vsyncpa [#allocation3], 0  ;;  %s394_s0 = inlined_call_operand.hbm [shape: f32[2,128], index: 0, kind: input, shape index: {}]   ;;  %s395_s1 = inlined_call_operand.hbm [shape: f32[2,128], index: 1, kind: input, shape index: {}]   ;;  %s396_s2 = inlined_call_operand.hbm [shape: f32[2,128], index: 2, kind: output, shape index: {}]  }
   0x1   :  { %8 = vsyncpa [#allocation6], 0 }
   0x2   :  { %9 = vsyncpa [#allocation4], 0  ;;  %s15_s11 = sshll.u32 %s394_s0, 4  ;;  %s314_s12 = smov [#allocation2]   ;;  %s16_s11 = int_to_ptr.hbm [resolvable:$true] %s15_s11 }
   0x3   :  { %s17_s13 = sshll.u32 %s314_s12, 4  ;;  %s26_s16 = sshll.u32 %s395_s1, 4  ;;  %s18_s13 = int_to_ptr.vmem [resolvable:$true] %s17_s13  ;;  %s27_s16 = int_to_ptr.hbm [resolvable:$true] %s26_s16 }
   0x4   :  { %20 = dma.hbm_to_vmem [thread:$0]  %s16_s11, 32, %s18_s13, [#allocation3]  }
   0x5   :  { %s315_s17 = smov [#allocation5]  }
   0x6   :  { %s28_s18 = sshll.u32 %s315_s17, 4  ;;  %s29_s18 = int_to_ptr.vmem [resolvable:$true] %s28_s18 }
   0x7   :  { %31 = dma.hbm_to_vmem [thread:$0]  %s27_s16, 32, %s29_s18, [#allocation6]  }
   0x8   :  { %308 = dma.done.wait [#allocation3], 32  }
   0x9   :  { %309 = vsyncadd [#allocation3], 4294967264 }
   0xa   :  { %310 = dma.done.wait [#allocation6], 32  }
   0xb   :  { %311 = vsyncadd [#allocation6], 4294967264  ;;  %v42_v0 = vld [vmem:[#allocation2] sm:$0x3]  ;;  %v234_v1 = vld [vmem:[#allocation5] ss:$0 sm:$0xff] }
   0xc   :  { %v235_v2 = vld [vmem:[#allocation5 + $0x1] ss:$0 sm:$0xff]  ;;  %v44_v3 = vmul.f32 %v234_v1, %v42_v0  ;;  %v316_v16 = vmov 683565275   ;;  %v317_v18 = vmov 2475754826  }
   0xd   :  { %v318_v20 = vmov 2131351028   ;;  %v319_v22 = vmov 2102212464   ;;  %v320_v24 = vmov 920167782  }
   0xe   :  { %v345_v4 = vadd.f32 %v235_v2, %v44_v3  ;;  %v321_v30 = vmov 1326507024   ;;  %s323_s0 = smov [#allocation7]   ;;  %s210_s21 = sshll.u32 %s396_s2, 4  ;;  %s211_s21 = int_to_ptr.hbm [resolvable:$true] %s210_s21 }
   0xf   :  { %s208_s1 = sshll.u32 %s323_s0, 4  ;;  %s209_s1 = int_to_ptr.vmem [resolvable:$true] %s208_s1 }
  0x10   :  { %v50_v5 = vand.u32 2139095040, %v345_v4  ;;  %v47_v7 = vand.u32 2147483647, %v345_v4  ;;  %vm49_vm12 = vcmp.lt.s32.totalorder %v345_v4, 0 }
  0x12   :  { %v51_v6 = vshrl.u32 %v50_v5, 23  ;;  %v54_v10 = vand.u32 8388607, %v47_v7  ;;  %v322_v5 = vmov 0   ;;  %vm48_vm13 = vcmp.le.f32.partialorder %v47_v7, 0.7853982 }
  0x14   :  { %v221_v8 = vadd.s32 4294967169, %v51_v6  ;;  %v55_v13 = vor.u32 8388608, %v54_v10 }
  0x16   :  { %v57_v9 = vadd.s32 1, %v221_v8  ;;  %v354_v32 = vshll.u32 %v55_v13, 8 }
  0x18   :  { %vm58_vm0 = vcmp.gt.s32.totalorder %v57_v9, 0  ;;  %v96_v44 = vand.u32 65535, %v354_v32  ;;  %v97_v45 = vshrl.u32 %v354_v32, 16 }
  0x19   :  { %v59_v11 = vsel %vm58_vm0, %v57_v9, 0 }
  0x1a   :  { %v61_v12 = vand.u32 31, %v59_v11  ;;  %v351_v14 = vshrl.u32 %v59_v11, 5 }
  0x1c   :  { %v62_v15 = vsub.s32 32, %v61_v12  ;;  %v64_v17 = vshll.u32 %v316_v16, %v61_v12  ;;  %v67_v19 = vshll.u32 %v317_v18, %v61_v12  ;;  %v70_v21 = vshll.u32 %v318_v20, %v61_v12 }
  0x1d   :  { %v73_v23 = vshll.u32 %v319_v22, %v61_v12  ;;  %v76_v25 = vshll.u32 %v320_v24, %v61_v12  ;;  %vm79_vm1 = vcmp.lt.s32.totalorder %v351_v14, 1  ;;  %vm82_vm2 = vcmp.lt.s32.totalorder %v351_v14, 4 }
  0x1e   :  { %v65_v26 = vshrl.u32 %v317_v18, %v62_v15  ;;  %v68_v27 = vshrl.u32 %v318_v20, %v62_v15  ;;  %v71_v28 = vshrl.u32 %v319_v22, %v62_v15  ;;  %v74_v29 = vshrl.u32 %v320_v24, %v62_v15 }
  0x1f   :  { %v77_v31 = vshrl.u32 %v321_v30, %v62_v15  ;;  %vm81_vm3 = vcmp.lt.s32.totalorder %v351_v14, 3  ;;  %vm80_vm4 = vcmp.lt.s32.totalorder %v351_v14, 2  ;;  %v63_v52 = vshrl.u32 %v316_v16, %v62_v15 }
  0x20   :  { %v66_v33 = vor.u32 %v65_v26, %v64_v17  ;;  %v69_v34 = vor.u32 %v68_v27, %v67_v19  ;;  %v72_v35 = vor.u32 %v71_v28, %v70_v21  ;;  %v75_v36 = vor.u32 %v74_v29, %v73_v23 }
  0x21   :  { %v78_v37 = vor.u32 %v77_v31, %v76_v25 }
  0x22   :  { %v87_v38 = vsel %vm79_vm1, %v66_v33, %v69_v34  ;;  %v91_v39 = vsel %vm79_vm1, %v69_v34, %v72_v35  ;;  %v88_v40 = vsel %vm82_vm2, %v75_v36, 920167782  ;;  %v83_v1 = vsel %vm79_vm1, %v63_v52, %v66_v33 }
  0x23   :  { %v92_v41 = vsel %vm82_vm2, %v78_v37, 1326507024  ;;  %v89_v42 = vsel %vm81_vm3, %v72_v35, %v88_v40  ;;  %v84_v3 = vsel %vm82_vm2, %v72_v35, 2102212464  ;;  %vm190_vm1 = vweird.f32 %v345_v4 }
  0x24   :  { %v93_v43 = vsel %vm81_vm3, %v75_v36, %v92_v41  ;;  %v90_v46 = vsel %vm80_vm4, %v87_v38, %v89_v42  ;;  %v85_v16 = vsel %vm81_vm3, %v69_v34, %v84_v3 }
  0x25   :  { %v94_v47 = vsel %vm80_vm4, %v91_v39, %v93_v43  ;;  %v120_v50 = vand.u32 65535, %v90_v46  ;;  %v121_v51 = vshrl.u32 %v90_v46, 16  ;;  %v86_v24 = vsel %vm80_vm4, %v83_v1, %v85_v16 }
  0x26   :  { %v98_v48 = vand.u32 65535, %v94_v47  ;;  %v99_v49 = vshrl.u32 %v94_v47, 16  ;;  %v140_v28 = vmul.u32 %v354_v32, %v86_v24 }
  0x27   :  { %v122_v56 = vmul.u32 %v120_v50, %v96_v44  ;;  %v123_v57 = vmul.u32 %v121_v51, %v96_v44  ;;  %v124_v58 = vmul.u32 %v120_v50, %v97_v45  ;;  %v125_v62 = vmul.u32 %v121_v51, %v97_v45 }
  0x28   :  { %v100_v53 = vmul.u32 %v98_v48, %v96_v44  ;;  %v101_v54 = vmul.u32 %v99_v49, %v96_v44  ;;  %v102_v55 = vmul.u32 %v98_v48, %v97_v45  ;;  %v103_v59 = vmul.u32 %v99_v49, %v97_v45 }
  0x29   :  { %v126_v63 = vshll.u32 %v123_v57, 16  ;;  %v128_v0 = vshll.u32 %v124_v58, 16  ;;  %v127_v13 = vshrl.u32 %v123_v57, 16  ;;  %v129_v20 = vshrl.u32 %v124_v58, 16 }
  0x2a   :  { %v104_v60 = vshll.u32 %v101_v54, 16  ;;  %v106_v61 = vshll.u32 %v102_v55, 16  ;;  %v105_v9 = vshrl.u32 %v101_v54, 16  ;;  %v107_v17 = vshrl.u32 %v102_v55, 16 }
  0x2b   :  { %vm130_vm6 = vc.u32 %v122_v56, %v126_v63  ;;  %v132_v8 = vadd.s32 %v126_v63, %v122_v56 }
  0x2c   :  { %vm108_vm5 = vc.u32 %v100_v53, %v104_v60  ;;  %v110_v2 = vadd.s32 %v104_v60, %v100_v53  ;;  %v131_v11 = vsel %vm130_vm6, 1, %v322_v5 }
  0x2d   :  { %v109_v6 = vsel %vm108_vm5, 1, %v322_v5  ;;  %v133_v15 = vadd.s32 %v131_v11, %v125_v62  ;;  %vm134_vm8 = vc.u32 %v132_v8, %v128_v0  ;;  %v136_v23 = vadd.s32 %v132_v8, %v128_v0 }
  0x2e   :  { %v111_v10 = vadd.s32 %v109_v6, %v103_v59  ;;  %vm112_vm7 = vc.u32 %v110_v2, %v106_v61  ;;  %v135_v19 = vsel %vm134_vm8, 1, %v322_v5 }
  0x2f   :  { %v113_v12 = vsel %vm112_vm7, 1, %v322_v5  ;;  %v137_v21 = vadd.s32 %v135_v19, %v133_v15 }
  0x30   :  { %v115_v18 = vadd.s32 %v113_v12, %v111_v10 }
  0x31   :  { %v138_v25 = vadd.s32 %v137_v21, %v127_v13 }
  0x32   :  { %v116_v22 = vadd.s32 %v115_v18, %v105_v9 }
  0x33   :  { %v139_v27 = vadd.s32 %v138_v25, %v129_v20 }
  0x34   :  { %v117_v26 = vadd.s32 %v116_v22, %v107_v17 }
  0x35   :  { %v143_v29 = vadd.s32 1, %v139_v27 }
  0x36   :  { %vm142_vm9 = vc.u32 %v117_v26, %v136_v23  ;;  %v141_v14 = vadd.s32 %v136_v23, %v117_v26 }
  0x37   :  { %v144_v30 = vsel %vm142_vm9, %v143_v29, %v139_v27 }
  0x38   :  { %v145_v31 = vadd.s32 %v144_v30, %v140_v28 }
  0x3a   :  { %v146_v33 = vadd.s32 536870912, %v145_v31 }
  0x3c   :  { %v147_v34 = vshrl.u32 %v146_v33, 30 }
  0x3e   :  { %v148_v35 = vshll.u32 %v147_v34, 30  ;;  %v171_v52 = vsub.s32 4, %v147_v34 }
  0x40   :  { %v149_v36 = vsub.s32 %v145_v31, %v148_v35  ;;  %v172_v55 = vsel %vm49_vm12, %v171_v52, %v147_v34 }
  0x41   :  { %v174_v58 = vsel %vm48_vm13, 0, %v172_v55 }
  0x42   :  { %vm150_vm10 = vcmp.lt.s32.totalorder %v149_v36, 0  ;;  %v151_v37 = vsub.s32 0, %v149_v36  ;;  %v191_v63 = vadd.s32 3, %v174_v58 }
  0x44   :  { %v152_v38 = vsel %vm150_vm10, %v151_v37, %v149_v36  ;;  %v192_v5 = vand.u32 3, %v191_v63 }
  0x45   :  { %v153_v39 = vclz %v152_v38 }
  0x46   :  { %vm197_vm14 = vcmp.eq.s32.totalorder %v192_v5, 2  ;;  %vm194_vm15 = vcmp.eq.s32.totalorder %v192_v5, 0  ;;  %vm193_vm0 = vcmp.lt.s32.totalorder %v192_v5, 2 }
  0x47   :  { %v222_v40 = vadd.s32 4294967294, %v153_v39 }
  0x49   :  { %vm223_vm11 = vcmp.lt.s32.totalorder %v222_v40, 0 }
  0x4a   :  { %v156_v41 = vsel %vm223_vm11, 0, %v222_v40 }
  0x4b   :  { %v157_v42 = vsub.s32 32, %v156_v41  ;;  %v158_v43 = vshll.u32 %v149_v36, %v156_v41  ;;  %v161_v44 = vsub.s32 4294967266, %v156_v41 }
  0x4d   :  { %v159_v32 = vshrl.u32 %v141_v14, %v157_v42  ;;  %v162_v45 = vadd.s32 127, %v161_v44 }
  0x4f   :  { %v160_v46 = vor.u32 %v159_v32, %v158_v43  ;;  %v163_v47 = vshll.u32 %v162_v45, 23 }
  0x51   :  { %v164_v48 = vor.u32 4788187, %v163_v47  ;;  %v167_v49 = vcvt.s32.f32 %v160_v46 }
  0x53   :  { %v165_v50 = vand.u32 2147483647, %v164_v48 }
  0x55   :  { %v168_v51 = vmul.f32 %v167_v49, %v165_v50 }
  0x57   :  { %v169_v53 = vxor.u32 2147483648, %v168_v51 }
  0x59   :  { %v170_v54 = vsel %vm49_vm12, %v169_v53, %v168_v51 }
  0x5a   :  { %v173_v56 = vsel %vm48_vm13, %v345_v4, %v170_v54 }
  0x5b   :  { %v175_v57 = vmul.f32 %v173_v56, %v173_v56 }
  0x5d   :  { %v176_v59 = vmul.f32 -0.001358992, %v175_v57  ;;  %v183_v60 = vmul.f32 -0.00019511016, %v175_v57 }
  0x5f   :  { %v177_v61 = vadd.f32 0.041655596, %v176_v59  ;;  %v184_v62 = vadd.f32 0.008332121, %v183_v60 }
  0x61   :  { %v178_v0 = vmul.f32 %v177_v61, %v175_v57  ;;  %v185_v1 = vmul.f32 %v184_v62, %v175_v57 }
  0x63   :  { %v179_v2 = vadd.f32 -0.4999988, %v178_v0  ;;  %v186_v3 = vadd.f32 -0.16666654, %v185_v1 }
  0x65   :  { %v180_v6 = vmul.f32 %v179_v2, %v175_v57  ;;  %v187_v8 = vmul.f32 %v186_v3, %v175_v57 }
  0x67   :  { %v181_v7 = vadd.f32 1.0, %v180_v6  ;;  %v188_v9 = vadd.f32 1.0, %v187_v8 }
  0x69   :  { %v189_v10 = vmul.f32 %v188_v9, %v173_v56  ;;  %v198_v11 = vxor.u32 2147483648, %v181_v7 }
  0x6b   :  { %v195_v12 = vxor.u32 2147483648, %v189_v10  ;;  %v199_v13 = vsel %vm197_vm14, %v198_v11, %v189_v10 }
  0x6d   :  { %v196_v15 = vsel %vm194_vm15, %v181_v7, %v195_v12 }
  0x6e   :  { %v200_v16 = vsel %vm193_vm0, %v196_v15, %v199_v13 }
  0x6f   :  { %v201_v17 = vsel %vm190_vm1, nan, %v200_v16 }
  0x70   :  { %202 = vst [vmem:[#allocation7] sm:$0x3] %v201_v17 }
  0x71   :  { %213 = dma.vmem_to_hbm [thread:$0]  %s209_s1, 32, %s211_s21, [#allocation4]  }
  0x72   :  { %312 = dma.done.wait [#allocation4], 32  }
  0x73   :  { %313 = vsyncadd [#allocation4], 4294967264 }
  0x74   :  { %218 = vsyncpa [#allocation3], 1 }
  0x75   :  { %219 = vsyncpa [#allocation6], 1 }
  0x76   :  { %220 = vsyncpa [#allocation4], 1 }

</bundles_post_ra>
